<compile_context>
chip_gen: v6e
topology: v6e:2x2x1
jax: 0.10.0
libtpu: 0.0.40
codegen_flags: <defaults>
</compile_context>

<pallas_src>
import jax
import jax.numpy as jnp
from jax.experimental import pallas as pl
from jax.experimental.pallas import tpu as pltpu


def _round_up(x, m):
    return ((x + m - 1) // m) * m


def _head_kernel(x_ref, w1_ref, b1_ref, w2_ref, b2_ref, o_ref):
    # dense: bf16 operands straight onto the MXU, f32 accumulation.
    h = jnp.dot(x_ref[...], w1_ref[...], preferred_element_type=jnp.float32)
    # bias add + tanh in f32 (safe on v5e's f32-only VPU/EUP path).
    h = jnp.tanh(h + b1_ref[...])
    # out_proj: feed the MXU in the weights' native dtype again.
    h = h.astype(w2_ref.dtype)
    out = jnp.dot(h, w2_ref[...], preferred_element_type=jnp.float32)
    # w2 is lane-padded (multiple of 128) for clean MXU lowering, but the HBM
    # output stays narrow (num_classes): slice the accumulator, add bias, store.
    nc = o_ref.shape[-1]
    o_ref[...] = (out[:, :nc] + b2_ref[...]).astype(o_ref.dtype)


def prepare_head_params(w1, b1, w2, b2, compute_dtype=jnp.bfloat16):
    """One-time weight preparation (pad + cast), hoisted off the per-call path.

    w1: [input_dim, inner_dim]  (transpose of nn.Linear's [out, in])
    b1: [inner_dim]
    w2: [inner_dim, num_classes]
    b2: [num_classes]
    """
    input_dim, inner_dim = w1.shape
    num_classes = w2.shape[1]

    inner_p = _round_up(inner_dim, 128)   # lane-dense hidden (no-op for 768/1024)
    cls_p = _round_up(num_classes, 128)   # lane-pad w2 only (output stays narrow)

    w1_p = jnp.pad(w1, ((0, 0), (0, inner_p - inner_dim))).astype(compute_dtype)
    w2_p = jnp.pad(w2, ((0, inner_p - inner_dim), (0, cls_p - num_classes))).astype(compute_dtype)
    # Biases kept f32 so the bias add happens on the f32 accumulator.
    b1_p = jnp.pad(b1, (0, inner_p - inner_dim)).reshape(1, inner_p).astype(jnp.float32)
    b2_p = b2.reshape(1, num_classes).astype(jnp.float32)

    return {
        "w1": w1_p, "b1": b1_p, "w2": w2_p, "b2": b2_p,
        "input_dim": input_dim, "num_classes": num_classes,
        "compute_dtype": compute_dtype,
    }


def bart_classification_head(features, params):
    """features: [B, input_dim]; params: output of prepare_head_params."""
    w1_p, b1_p, w2_p, b2_p = params["w1"], params["b1"], params["w2"], params["b2"]
    num_classes = params["num_classes"]
    compute_dtype = params["compute_dtype"]
    out_dtype = features.dtype

    B, input_dim = features.shape
    assert input_dim == params["input_dim"]
    inner_p = w1_p.shape[1]
    cls_p = w2_p.shape[1]

    # Batch tile: small batches -> single grid step (one core, no duplicated
    # weight DMA on v7x); large batches -> tb=256 (fills 256x256 MXU on
    # v6e/v7x, amortizes per-step overhead on v5e). VMEM use stays ~4 MiB at
    # real BART dims, well under every generation's scoped default.
    if B <= 512:
        tb = _round_up(B, 8)
    else:
        tb = 256
    b_p = _round_up(B, tb)

    # Match the weights' dtype before the dot (avoid silent in-kernel promotion).
    x = features.astype(compute_dtype)
    # Pad batch rows only when needed; input_dim (K) is never padded — the block
    # spans the full K dim, so no activation HBM round-trip for aligned shapes.
    if b_p != B:
        x = jnp.pad(x, ((0, b_p - B), (0, 0)))

    grid = (b_p // tb,)
    resident = pl.Buffered(1)  # constant blocks: single-buffer, halve weight VMEM

    out = pl.pallas_call(
        _head_kernel,
        out_shape=jax.ShapeDtypeStruct((b_p, num_classes), out_dtype),
        grid=grid,
        in_specs=[
            # features: streamed per batch tile (double-buffered by default)
            pl.BlockSpec((tb, input_dim), lambda i: (i, 0)),
            # weights / biases: resident across the whole grid, single-buffered
            pl.BlockSpec((input_dim, inner_p), lambda i: (0, 0), pipeline_mode=resident),
            pl.BlockSpec((1, inner_p), lambda i: (0, 0), pipeline_mode=resident),
            pl.BlockSpec((inner_p, cls_p), lambda i: (0, 0), pipeline_mode=resident),
            pl.BlockSpec((1, num_classes), lambda i: (0, 0), pipeline_mode=resident),
        ],
        out_specs=pl.BlockSpec((tb, num_classes), lambda i: (i, 0)),
        compiler_params=pltpu.CompilerParams(
            dimension_semantics=("parallel",)),
    )(x, w1_p, b1_p, w2_p, b2_p)

    return out[:B]


def _reference(features, w1, b1, w2, b2, compute_dtype=jnp.float32):
    """Pure-JAX reference mirroring the kernel's dtype choices."""
    x = features.astype(compute_dtype)
    h = jnp.dot(x, w1.astype(compute_dtype), preferred_element_type=jnp.float32)
    h = jnp.tanh(h + b1.astype(jnp.float32))
    h = h.astype(compute_dtype)
    out = jnp.dot(h, w2.astype(compute_dtype), preferred_element_type=jnp.float32)
    out = out + b2.astype(jnp.float32)
    return out.astype(features.dtype)


if __name__ == "__main__":
    # Module config (small, synthetic): input_dim=32, inner_dim=32,
    # num_classes=4, activation_fn='tanh', pooler_dropout=0.0
    B, input_dim, inner_dim, num_classes = 8, 32, 32, 4

    key = jax.random.PRNGKey(0)
    k_x, k_w1, k_b1, k_w2, k_b2 = jax.random.split(key, 5)

    features = jax.random.normal(k_x, (B, input_dim), dtype=jnp.float32)
    # nn.Linear stores weight as [out, in]; we keep the [in, out] transpose.
    w1 = jax.random.normal(k_w1, (input_dim, inner_dim), dtype=jnp.float32) * 0.1
    b1 = jax.random.normal(k_b1, (inner_dim,), dtype=jnp.float32) * 0.1
    w2 = jax.random.normal(k_w2, (inner_dim, num_classes), dtype=jnp.float32) * 0.1
    b2 = jax.random.normal(k_b2, (num_classes,), dtype=jnp.float32) * 0.1

    # One-time weight prep (pad + bf16 cast), off the per-call hot path.
    params = prepare_head_params(w1, b1, w2, b2, compute_dtype=jnp.bfloat16)

    out = bart_classification_head(features, params)
    out = jax.block_until_ready(out)
    assert out.shape == (B, num_classes)

    # Check against a dtype-matched (bf16 operands, f32 accum) reference ...
    ref_bf16 = _reference(features, w1, b1, w2, b2, compute_dtype=jnp.bfloat16)
    assert jnp.allclose(out, ref_bf16, atol=5e-3, rtol=5e-3), "mismatch vs bf16 reference"
    # ... and loosely against the full-f32 reference (quantization tolerance).
    ref_f32 = _reference(features, w1, b1, w2, b2, compute_dtype=jnp.float32)
    assert jnp.allclose(out, ref_f32, atol=5e-2, rtol=5e-2), "mismatch vs f32 reference"

    print("KERNEL_OK")
</pallas_src>

<mosaic_0001>
module attributes {stable_mosaic.version = 11 : i64} {
  func.func @_head_kernel(%arg0: i32, %arg1: memref<8x32xbf16, #tpu.memory_space<vmem>>, %arg2: memref<32x128xbf16, #tpu.memory_space<vmem>>, %arg3: memref<1x128xf32, #tpu.memory_space<vmem>>, %arg4: memref<128x128xbf16, #tpu.memory_space<vmem>>, %arg5: memref<1x4xf32, #tpu.memory_space<vmem>>, %arg6: memref<8x4xf32, #tpu.memory_space<vmem>>) attributes {dimension_semantics = [#tpu.dimension_semantics<parallel>], iteration_bounds = array<i64: 1>, scalar_prefetch = 0 : i64, scratch_operands = 0 : i64, tpu.core_type = #tpu.core_type<tc>, window_params = [{transform_indices = @transform_0, window_bounds = array<i64: 8, 32>}, {pipeline_mode = #tpu.pipeline_mode<synchronous>, transform_indices = @transform_1, window_bounds = array<i64: 32, 128>}, {pipeline_mode = #tpu.pipeline_mode<synchronous>, transform_indices = @transform_2, window_bounds = array<i64: 1, 128>}, {pipeline_mode = #tpu.pipeline_mode<synchronous>, transform_indices = @transform_3, window_bounds = array<i64: 128, 128>}, {pipeline_mode = #tpu.pipeline_mode<synchronous>, transform_indices = @transform_4, window_bounds = array<i64: 1, 4>}, {transform_indices = @transform_5, window_bounds = array<i64: 8, 4>}]} {
    %c0 = arith.constant 0 : index
    %c0_0 = arith.constant 0 : index
    %0 = vector.load %arg1[%c0, %c0_0] : memref<8x32xbf16, #tpu.memory_space<vmem>>, vector<8x32xbf16>
    %c0_1 = arith.constant 0 : index
    %c0_2 = arith.constant 0 : index
    %1 = vector.load %arg2[%c0_1, %c0_2] : memref<32x128xbf16, #tpu.memory_space<vmem>>, vector<32x128xbf16>
    %cst = arith.constant dense<0.000000e+00> : vector<8x128xf32>
    %2 = tpu.matmul %0, %1, %cst {dimension_numbers = #tpu.dot_dimension_numbers<[1], [0], [0], [1], [0, 0, 1, 1], [], []>} : vector<8x32xbf16>, vector<32x128xbf16>, vector<8x128xf32> -> vector<8x128xf32>
    %c0_3 = arith.constant 0 : index
    %c0_4 = arith.constant 0 : index
    %3 = vector.load %arg3[%c0_3, %c0_4] : memref<1x128xf32, #tpu.memory_space<vmem>>, vector<1x128xf32>
    %4 = vector.broadcast %3 : vector<1x128xf32> to vector<8x128xf32>
    %5 = arith.addf %2, %4 : vector<8x128xf32>
    %6 = math.tanh %5 : vector<8x128xf32>
    %7 = arith.truncf %6 : vector<8x128xf32> to vector<8x128xbf16>
    %c0_5 = arith.constant 0 : index
    %c0_6 = arith.constant 0 : index
    %8 = vector.load %arg4[%c0_5, %c0_6] : memref<128x128xbf16, #tpu.memory_space<vmem>>, vector<128x128xbf16>
    %cst_7 = arith.constant dense<0.000000e+00> : vector<8x128xf32>
    %9 = tpu.matmul %7, %8, %cst_7 {dimension_numbers = #tpu.dot_dimension_numbers<[1], [0], [0], [1], [0, 0, 1, 1], [], []>} : vector<8x128xbf16>, vector<128x128xbf16>, vector<8x128xf32> -> vector<8x128xf32>
    %10 = vector.extract_strided_slice %9 {offsets = [0, 0], sizes = [8, 4], strides = [1, 1]} : vector<8x128xf32> to vector<8x4xf32>
    %c0_8 = arith.constant 0 : index
    %c0_9 = arith.constant 0 : index
    %11 = vector.load %arg5[%c0_8, %c0_9] : memref<1x4xf32, #tpu.memory_space<vmem>>, vector<1x4xf32>
    %12 = vector.broadcast %11 : vector<1x4xf32> to vector<8x4xf32>
    %13 = arith.addf %10, %12 : vector<8x4xf32>
    %c0_10 = arith.constant 0 : index
    %c0_11 = arith.constant 0 : index
    %14 = vector.load %arg6[%c0_10, %c0_11] : memref<8x4xf32, #tpu.memory_space<vmem>>, vector<8x4xf32>
    tpu.vector_store %arg6[%c0_10, %c0_11], %13 {strides = array<i32>} : memref<8x4xf32, #tpu.memory_space<vmem>>, vector<8x4xf32>,
    return
  }
  func.func @transform_0(%arg0: i32) -> (i32, i32) {
    %c0_i32 = arith.constant 0 : i32
    %c0_i32_0 = arith.constant 0 : i32
    return %arg0, %c0_i32 : i32, i32
  }
  func.func @transform_1(%arg0: i32) -> (i32, i32) {
    %c0_i32 = arith.constant 0 : i32
    %c0_i32_0 = arith.constant 0 : i32
    %c0_i32_1 = arith.constant 0 : i32
    return %c0_i32, %c0_i32_0 : i32, i32
  }
  func.func @transform_2(%arg0: i32) -> (i32, i32) {
    %c0_i32 = arith.constant 0 : i32
    %c0_i32_0 = arith.constant 0 : i32
    %c0_i32_1 = arith.constant 0 : i32
    return %c0_i32, %c0_i32_0 : i32, i32
  }
  func.func @transform_3(%arg0: i32) -> (i32, i32) {
    %c0_i32 = arith.constant 0 : i32
    %c0_i32_0 = arith.constant 0 : i32
    %c0_i32_1 = arith.constant 0 : i32
    return %c0_i32, %c0_i32_0 : i32, i32
  }
  func.func @transform_4(%arg0: i32) -> (i32, i32) {
    %c0_i32 = arith.constant 0 : i32
    %c0_i32_0 = arith.constant 0 : i32
    %c0_i32_1 = arith.constant 0 : i32
    return %c0_i32, %c0_i32_0 : i32, i32
  }
  func.func @transform_5(%arg0: i32) -> (i32, i32) {
    %c0_i32 = arith.constant 0 : i32
    %c0_i32_0 = arith.constant 0 : i32
    return %arg0, %c0_i32 : i32, i32
  }
}

</mosaic_0001>

<bundles_post_ra>
// kernel: tpu_custom_call.1
= control target key start
LH: loop header
LB: loop body
LE: loop exit
PB: predicated region body
PF: predicated region fallthrough
CT: control target
= control target key end

     0   :  { %10 = vsyncpa [#allocation3], 0  ;;  %s441_s0 = inlined_call_operand.hbm [shape: bf16[8,32], index: 0, kind: input, shape index: {}]   ;;  %s442_s1 = inlined_call_operand.hbm [shape: bf16[32,128], index: 1, kind: input, shape index: {}]   ;;  %s443_s2 = inlined_call_operand.vmem [shape: f32[1,128], index: 2, kind: input, shape index: {}]   ;;  %s444_s3 = inlined_call_operand.hbm [shape: bf16[128,128], index: 3, kind: input, shape index: {}]   ;;  %s445_s4 = inlined_call_operand.vmem [shape: f32[1,4], index: 4, kind: input, shape index: {}]   ;;  %s446_s5 = inlined_call_operand.vmem [shape: f32[8,4], index: 5, kind: output, shape index: {}]  }
   0x1   :  { %11 = vsyncpa [#allocation5], 0  ;;  %s386_s18 = smov [#allocation4]  }
   0x2   :  { %s27_s19 = sshll.u32 %s386_s18, 4  ;;  %s28_s19 = int_to_ptr.vmem [resolvable:$true] %s27_s19 }
   0x3   :  { %s330_s20 = scalar_lea.vmem %s28_s19, 256  ;;  %p335_p1 = scmp.lt.s32.totalorder %s28_s19, %s28_s19 }
   0x4   :  { %p331_p0 = scmp.ne.s32.totalorder %s28_s19, %s330_s20  ;;  %p336_p2 = scmp.lt.s32.totalorder %s330_s20, %s330_s20 }
   0x6   :  { %p337_p3 = por %p336_p2, %p335_p1 }
   0x8   :  { %p338_p4 = pnand %p337_p3, %p331_p0 }
   0xa   :  { %341 = shalt.err (!%p338_p4)
}
   0xb   :  { %s387_s21 = smov 64   ;;  %s388_s22 = smov 4  }
   0xc   :  { %33 = dma.hbm_to_vmem [thread:$0]  %s442_s1, 256, %s28_s19, [#allocation5], %s387_s21, %s387_s21, %s388_s22  }
   0xd   :  { %s389_s25 = smov [#allocation2]   ;;  %s390_s27 = smov [#allocation6]  }
   0xe   :  { %s18_s26 = sshll.u32 %s389_s25, 4  ;;  %s41_s28 = sshll.u32 %s390_s27, 4  ;;  %s19_s26 = int_to_ptr.vmem [resolvable:$true] %s18_s26  ;;  %s42_s28 = int_to_ptr.vmem [resolvable:$true] %s41_s28 }
   0xf   :  { %s350_s29 = scalar_lea.vmem %s19_s26, 64  ;;  %p355_p6 = scmp.lt.s32.totalorder %s19_s26, %s19_s26 }
  0x10   :  { %p351_p5 = scmp.ne.s32.totalorder %s19_s26, %s350_s29  ;;  %p356_p7 = scmp.lt.s32.totalorder %s350_s29, %s350_s29 }
  0x12   :  { %p357_p8 = por %p356_p7, %p355_p6 }
  0x14   :  { %p358_p9 = pnand %p357_p8, %p351_p5 }
  0x16   :  { %361 = shalt.err (!%p358_p9)
}
  0x17   :  { %21 = dma.hbm_to_vmem [thread:$0]  %s441_s0, 64, %s19_s26, [#allocation3]  }
  0x18   :  { %s370_s7 = scalar_lea.vmem %s42_s28, 1024  ;;  %p375_p11 = scmp.lt.s32.totalorder %s42_s28, %s42_s28 }
  0x19   :  { %p371_p10 = scmp.ne.s32.totalorder %s42_s28, %s370_s7  ;;  %p376_p12 = scmp.lt.s32.totalorder %s370_s7, %s370_s7 }
  0x1b   :  { %p377_p13 = por %p376_p12, %p375_p11 }
  0x1d   :  { %p378_p0 = pnand %p377_p13, %p371_p10 }
  0x1f   :  { %381 = shalt.err (!%p378_p0)
}
  0x20   :  { %47 = dma.hbm_to_vmem [thread:$0]  %s444_s3, 1024, %s42_s28, [#allocation5], %s387_s21, %s387_s21, %s388_s22  }
  0x21   :  { %382 = dma.done.wait [#allocation3], 64  }
  0x22   :  { %383 = vsyncadd [#allocation3], 4294967232 }
  0x23   :  { %384 = dma.done.wait [#allocation5], 1280  }
  0x24   :  { %385 = vsyncadd [#allocation5], 4294966016  ;;  %v391_v0 = vmov 0.0   ;;  %vm392_vm0 = vmmov 0   ;;  %v310_v1 = vld [vmem:[#allocation4 + $0x8] sm:$0xff]   ;;  %v311_v2 = vld [vmem:[#allocation4] sm:$0xff]  }
  0x25   :  { %275 = vmatprep.subr.bf16.mxu0 %v391_v0  ;;  %279 = vmatprep.mubr.msk.bf16.mxu0 %vm392_vm0, %v391_v0  ;;  %v312_v3 = vld [vmem:[#allocation6 + $0x38] sm:$0xff]   ;;  %v60_v4 = vld [vmem:[#allocation2] sm:$0xf]  ;;  %vm84_vm1 = vcmask 261120   ;;  %v313_v5 = vld [vmem:[#allocation6 + $0x30] sm:$0xff]   ;;  %vm242_vm2 = vcmask 31744  }
  0x26   :  { %283 = vmatprep.subr.bf16.mxu1 %v391_v0  ;;  %299 = vmatprep.mubr.msk.bf16.mxu1 %vm392_vm0, %v391_v0  ;;  %v314_v6 = vld [vmem:[#allocation6 + $0x28] sm:$0xff]   ;;  %v315_v7 = vld [vmem:[#allocation6 + $0x20] sm:$0xff]   ;;  %v316_v8 = vld [vmem:[#allocation6 + $0x18] sm:$0xff]  }
  0x27   :  { %276 = vmatpush3.bf16.msra.mxu0 %v310_v1  ;;  %284 = vmatpush3.bf16.msra.mxu1 %v312_v3  ;;  %v317_v9 = vld [vmem:[#allocation6 + $0x10] sm:$0xff]   ;;  %v318_v10 = vld [vmem:[#allocation6 + $0x8] sm:$0xff]   ;;  %v319_v11 = vld [vmem:[#allocation6] sm:$0xff]  }
  0x28   :  { %277 = vmatprep.subr.bf16.mxu0 %v391_v0  ;;  %285 = vmatprep.subr.bf16.mxu1 %v391_v0  ;;  %v250_v12 = vld [vmem:[%s443_s2] ss:$0 sm:$0xff] }
  0x29   :  { %v262_v20 = vld [vmem:[%s445_s4] ss:$0 sm:$0xff] }
  0x2b   :  { %278 = vmatpush3.bf16.msra.mxu0 %v311_v2  ;;  %286 = vmatpush3.bf16.msra.mxu1 %v313_v5 }
  0x2c   :  { %287 = vmatprep.subr.bf16.mxu1 %v391_v0 }
  0x2e   :  { %280 = vmatmul.mubr.msk.bf16.vlgmr.msra.gmra.mxu0 %vm84_vm1, %v60_v4 }
  0x2f   :  { %288 = vmatpush3.bf16.msra.mxu1 %v314_v6 }
  0x30   :  { %289 = vmatprep.subr.bf16.mxu1 %v391_v0 }
  0x33   :  { %290 = vmatpush3.bf16.msra.mxu1 %v315_v7 }
  0x34   :  { %291 = vmatprep.subr.bf16.mxu1 %v391_v0 }
  0x37   :  { %292 = vmatpush3.bf16.msra.mxu1 %v316_v8 }
  0x38   :  { %293 = vmatprep.subr.bf16.mxu1 %v391_v0 }
  0x3b   :  { %294 = vmatpush3.bf16.msra.mxu1 %v317_v9 }
  0x3c   :  { %295 = vmatprep.subr.bf16.mxu1 %v391_v0 }
  0x3f   :  { %296 = vmatpush3.bf16.msra.mxu1 %v318_v10 }
  0x40   :  { %297 = vmatprep.subr.bf16.mxu1 %v391_v0 }
  0x43   :  { %298 = vmatpush3.bf16.msra.mxu1 %v319_v11 }
  0xee   :  { %v122_v13 = vpop.f32.mrf.mxu0 }
  0xef   :  { %v123_v14 = vadd.f32 %v250_v12, %v122_v13 }
  0xf0   :  { %v281_v15 = vpop.f32.mrf.mxu0 }
  0xf1   :  { %320 = vtanh.f32 %v123_v14 }
  0xf2   :  { %v125_v16 = vpop.f32.mrf.mxu0 }
  0xf4   :  { %v282_v17 = vpop.f32.mrf.mxu0 }
  0xfe   :  { %v321_v18 = vpop.eup %320 }
  0xff   :  { %v129_v19 = vpack.c.bf16 %v321_v18, %v321_v18 }
 0x101   :  { %300 = vmatmul.mubr.bf16.vlgmr.msra.gmra.mxu1 %v129_v19 }
 0x1c1   :  { %v228_v21 = vpop.f32.mrf.mxu1 }
 0x1c2   :  { %v241_v22 = vadd.f32 %v262_v20, %v228_v21 }
 0x1c3   :  { %v301_v23 = vpop.f32.mrf.mxu1 }
 0x1c4   :  { %243 = vst.msk [vmem:[%s446_s5] sm:$0xff] %vm242_vm2, %v241_v22 }
 0x1c5   :  { %v231_v24 = vpop.f32.mrf.mxu1 }
 0x1c7   :  { %v302_v25 = vpop.f32.mrf.mxu1 }
 0x1c8   :  { %248 = vsyncpa [#allocation3], 1 }
 0x1c9   :  { %249 = vsyncpa [#allocation5], 1 }

</bundles_post_ra>
